<compile_context>
chip_gen: v6e
topology: v6e:2x2x1
jax: 0.10.0
libtpu: 0.0.40
codegen_flags: <defaults>
</compile_context>

<pallas_src>
import math
import jax
import jax.numpy as jnp
from jax.experimental import pallas as pl
from jax.experimental.pallas import tpu as pltpu

BN_EPS = 1e-5
LANE = 128


# ----------------------------- fused kernel ---------------------------------

def make_fused_mlp_kernel(n_hidden):
    """Fused kernel: n_hidden x [Linear -> BN -> ReLU] then output Linear.

    Refs: x [N,128], w_stack [L,128,128], small [2H+1,128], out [N,128].
    small rows: (gamma_0, beta_0, gamma_1, beta_1, ..., b_out).
    """

    def kernel(x_ref, w_ref, sp_ref, o_ref):
        h = x_ref[...]                                         # [N, 128] f32
        for l in range(n_hidden):
            z = jnp.dot(h, w_ref[l],
                        preferred_element_type=jnp.float32)    # [N, 128]
            # Training-mode BatchNorm1d, one-pass stats (biased variance).
            # The hidden Linear bias is omitted: (z+b) - mean(z+b) == z - mean(z).
            inv_n = 1.0 / z.shape[0]
            mean = jnp.sum(z, axis=0, keepdims=True) * inv_n            # [1,128]
            mean_sq = jnp.sum(z * z, axis=0, keepdims=True) * inv_n     # [1,128]
            var = jnp.maximum(mean_sq - mean * mean, 0.0)
            gamma = sp_ref[2 * l:2 * l + 1, :]
            beta = sp_ref[2 * l + 1:2 * l + 2, :]
            scale = gamma * jax.lax.rsqrt(var + BN_EPS)         # padded lanes: gamma=0
            shift = beta - mean * scale
            # ReLU; Dropout p=0.0 is identity.
            h = jnp.maximum(z * scale + shift, 0.0)
        # Output Linear (bias in last row of sp_ref, zero in padded lanes).
        o_ref[...] = (jnp.dot(h, w_ref[n_hidden],
                              preferred_element_type=jnp.float32)
                      + sp_ref[2 * n_hidden:2 * n_hidden + 1, :])

    return kernel


# ----------------------------- wrapper ---------------------------------------

def exstream_forward(x, packed):
    """ExStream.forward(x) as one fused pallas_call.

    Returns the lane-dense padded [N, 128] output slab; the logical logits are
    out[:, :num_classes] (slice in the consumer to avoid an extra per-call op).
    """
    w_stack = packed["w_stack"]          # [L, 128, 128] f32, padded at init
    small = packed["small"]              # [2H+1, 128]   f32, padded at init
    n_hidden = packed["n_hidden"]
    N, din = x.shape

    # Only the activation needs per-call padding (it is not static).
    x_p = x if din == LANE else jnp.pad(x, ((0, 0), (0, LANE - din)))

    L = w_stack.shape[0]
    flops = 2 * N * LANE * LANE * L
    transcendentals = n_hidden * LANE    # one rsqrt per feature per hidden layer
    bytes_accessed = 4 * (x_p.size + w_stack.size + small.size + N * LANE)

    vmem = pl.BlockSpec(memory_space=pltpu.MemorySpace.VMEM)
    out = pl.pallas_call(
        make_fused_mlp_kernel(n_hidden),
        out_shape=jax.ShapeDtypeStruct((N, LANE), jnp.float32),
        in_specs=[vmem, vmem, vmem],
        out_specs=vmem,
        compiler_params=pltpu.CompilerParams(
            vmem_limit_bytes=32 * 1024 * 1024),
        cost_estimate=pl.CostEstimate(
            flops=flops,
            transcendentals=transcendentals,
            bytes_accessed=bytes_accessed),
    )(x_p, w_stack, small)
    return out


# --------------------------- parameter setup ---------------------------------

def init_exstream_params(key, shape):
    """Mirror ExStream.init_weights: W ~ N(0, sqrt(2/(fan_in+fan_out))), bias=1.
    BatchNorm params: gamma=1, beta=0 (PyTorch defaults).

    Returns (packed, raw):
      packed: dict with
        w_stack [L,128,128]  -- every layer weight zero-padded to 128x128
        small   [2H+1,128]   -- gamma_l, beta_l rows per hidden layer (padded
                                lanes 0) and the output bias row (padded 0)
        n_hidden, num_classes
      raw: list of unpadded per-layer params for the pure-JAX reference.
    Hidden-layer Linear biases are not stored: BN mean-subtraction cancels them.
    """
    n_layers = len(shape) - 1
    n_hidden = n_layers - 1

    raw = []
    w_stack = jnp.zeros((n_layers, LANE, LANE), jnp.float32)
    small = jnp.zeros((2 * n_hidden + 1, LANE), jnp.float32)

    for i in range(n_layers):
        fan_in, fan_out = shape[i], shape[i + 1]
        key, sub = jax.random.split(key)
        std = math.sqrt(2.0 / (fan_in + fan_out))
        # Stored as [Din, Dout] (transpose of PyTorch's [out, in]).
        w = std * jax.random.normal(sub, (fan_in, fan_out), dtype=jnp.float32)
        w_stack = w_stack.at[i, :fan_in, :fan_out].set(w)
        if i < n_hidden:                           # hidden layer: has BatchNorm
            gamma = jnp.ones((fan_out,), jnp.float32)
            beta = jnp.zeros((fan_out,), jnp.float32)
            small = small.at[2 * i, :fan_out].set(gamma)       # padded lanes stay 0
            small = small.at[2 * i + 1, :fan_out].set(beta)
            raw.append((w, gamma, beta))
        else:                                      # output layer: plain Linear
            b = jnp.ones((fan_out,), jnp.float32)              # bias init = 1
            small = small.at[2 * n_hidden, :fan_out].set(b)
            raw.append((w, b))

    packed = {"w_stack": w_stack, "small": small,
              "n_hidden": n_hidden, "num_classes": shape[-1]}
    return packed, raw


# Pure-JAX reference (matches PyTorch layer-by-layer, INCLUDING the hidden
# bias=1 that BN cancels, and two-pass batch statistics).
def exstream_forward_ref(x, raw_params):
    h = x
    for (w, gamma, beta) in raw_params[:-1]:
        z = h @ w + 1.0                       # ExStream initializes bias to 1
        mean = jnp.mean(z, axis=0, keepdims=True)
        var = jnp.mean((z - mean) ** 2, axis=0, keepdims=True)
        z = (z - mean) * jax.lax.rsqrt(var + BN_EPS) * gamma[None, :] + beta[None, :]
        h = jnp.maximum(z, 0.0)
    w, b = raw_params[-1]
    return h @ w + b[None, :]


# TODO(synk): Dropout with p>0 and BatchNorm running_mean/var side-effect
# updates are omitted; module defaults (p=0.0, forward output) are exact.

if __name__ == "__main__":
    # shape = [input_dim, hidden1, hidden2, num_classes]
    mlp_shape = [32, 64, 64, 10]
    batch = 8

    key = jax.random.PRNGKey(0)
    key, kx = jax.random.split(key)
    x = jax.random.normal(kx, (batch, mlp_shape[0]), dtype=jnp.float32)

    packed, raw = init_exstream_params(key, mlp_shape)

    out_pad = jax.block_until_ready(exstream_forward(x, packed))
    out = out_pad[:, :packed["num_classes"]]      # logical logits
    ref = exstream_forward_ref(x, raw)

    assert out.shape == (batch, mlp_shape[-1])
    assert jnp.allclose(out, ref, atol=1e-4, rtol=1e-4), "mismatch vs reference"
    # Padded lanes of the output slab must be exactly zero (lane-dense store).
    assert jnp.all(out_pad[:, packed["num_classes"]:] == 0.0)

    print("KERNEL_OK")
</pallas_src>

<mosaic_0001>
module attributes {stable_mosaic.version = 11 : i64} {
  func.func @kernel(%arg0: memref<8x128xf32, #tpu.memory_space<vmem>>, %arg1: memref<3x128x128xf32, #tpu.memory_space<vmem>>, %arg2: memref<5x128xf32, #tpu.memory_space<vmem>>, %arg3: memref<8x128xf32, #tpu.memory_space<vmem>>) attributes {dimension_semantics = [], scalar_prefetch = 0 : i64, scratch_operands = 0 : i64, tpu.core_type = #tpu.core_type<tc>} {
    %c0 = arith.constant 0 : index
    %c0_0 = arith.constant 0 : index
    %0 = vector.load %arg0[%c0, %c0_0] : memref<8x128xf32, #tpu.memory_space<vmem>>, vector<8x128xf32>
    %c0_1 = arith.constant 0 : index
    %c0_2 = arith.constant 0 : index
    %c0_3 = arith.constant 0 : index
    %1 = vector.load %arg1[%c0_1, %c0_2, %c0_3] : memref<3x128x128xf32, #tpu.memory_space<vmem>>, vector<1x128x128xf32>
    %2 = vector.shape_cast %1 : vector<1x128x128xf32> to vector<128x128xf32>
    %cst = arith.constant dense<0.000000e+00> : vector<8x128xf32>
    %3 = tpu.matmul %0, %2, %cst {dimension_numbers = #tpu.dot_dimension_numbers<[1], [0], [0], [1], [0, 0, 1, 1], [], []>} : vector<8x128xf32>, vector<128x128xf32>, vector<8x128xf32> -> vector<8x128xf32>
    %cst_4 = arith.constant dense<0.000000e+00> : vector<128xf32>
    %4 = vector.multi_reduction <add>, %3, %cst_4 [0] : vector<8x128xf32> to vector<128xf32>
    %5 = vector.shape_cast %4 : vector<128xf32> to vector<1x128xf32>
    %cst_5 = arith.constant 1.250000e-01 : f32
    %6 = vector.broadcast %cst_5 : f32 to vector<1x128xf32>
    %7 = arith.mulf %5, %6 : vector<1x128xf32>
    %8 = arith.mulf %3, %3 : vector<8x128xf32>
    %cst_6 = arith.constant dense<0.000000e+00> : vector<128xf32>
    %9 = vector.multi_reduction <add>, %8, %cst_6 [0] : vector<8x128xf32> to vector<128xf32>
    %10 = vector.shape_cast %9 : vector<128xf32> to vector<1x128xf32>
    %cst_7 = arith.constant 1.250000e-01 : f32
    %11 = vector.broadcast %cst_7 : f32 to vector<1x128xf32>
    %12 = arith.mulf %10, %11 : vector<1x128xf32>
    %13 = arith.mulf %7, %7 : vector<1x128xf32>
    %14 = arith.subf %12, %13 : vector<1x128xf32>
    %cst_8 = arith.constant 0.000000e+00 : f32
    %15 = vector.broadcast %cst_8 : f32 to vector<1x128xf32>
    %16 = arith.maximumf %14, %15 : vector<1x128xf32>
    %c0_9 = arith.constant 0 : index
    %c0_10 = arith.constant 0 : index
    %17 = vector.load %arg2[%c0_9, %c0_10] : memref<5x128xf32, #tpu.memory_space<vmem>>, vector<1x128xf32>
    %c1 = arith.constant 1 : index
    %c0_11 = arith.constant 0 : index
    %18 = vector.load %arg2[%c1, %c0_11] : memref<5x128xf32, #tpu.memory_space<vmem>>, vector<1x128xf32>
    %cst_12 = arith.constant 9.99999974E-6 : f32
    %19 = vector.broadcast %cst_12 : f32 to vector<1x128xf32>
    %20 = arith.addf %16, %19 : vector<1x128xf32>
    %21 = math.rsqrt %20 : vector<1x128xf32>
    %22 = arith.mulf %17, %21 : vector<1x128xf32>
    %23 = arith.mulf %7, %22 : vector<1x128xf32>
    %24 = arith.subf %18, %23 : vector<1x128xf32>
    %25 = vector.broadcast %22 : vector<1x128xf32> to vector<8x128xf32>
    %26 = arith.mulf %3, %25 : vector<8x128xf32>
    %27 = vector.broadcast %24 : vector<1x128xf32> to vector<8x128xf32>
    %28 = arith.addf %26, %27 : vector<8x128xf32>
    %cst_13 = arith.constant 0.000000e+00 : f32
    %29 = vector.broadcast %cst_13 : f32 to vector<8x128xf32>
    %30 = arith.maximumf %28, %29 : vector<8x128xf32>
    %c1_14 = arith.constant 1 : index
    %c0_15 = arith.constant 0 : index
    %c0_16 = arith.constant 0 : index
    %31 = vector.load %arg1[%c1_14, %c0_15, %c0_16] : memref<3x128x128xf32, #tpu.memory_space<vmem>>, vector<1x128x128xf32>
    %32 = vector.shape_cast %31 : vector<1x128x128xf32> to vector<128x128xf32>
    %cst_17 = arith.constant dense<0.000000e+00> : vector<8x128xf32>
    %33 = tpu.matmul %30, %32, %cst_17 {dimension_numbers = #tpu.dot_dimension_numbers<[1], [0], [0], [1], [0, 0, 1, 1], [], []>} : vector<8x128xf32>, vector<128x128xf32>, vector<8x128xf32> -> vector<8x128xf32>
    %cst_18 = arith.constant dense<0.000000e+00> : vector<128xf32>
    %34 = vector.multi_reduction <add>, %33, %cst_18 [0] : vector<8x128xf32> to vector<128xf32>
    %35 = vector.shape_cast %34 : vector<128xf32> to vector<1x128xf32>
    %cst_19 = arith.constant 1.250000e-01 : f32
    %36 = vector.broadcast %cst_19 : f32 to vector<1x128xf32>
    %37 = arith.mulf %35, %36 : vector<1x128xf32>
    %38 = arith.mulf %33, %33 : vector<8x128xf32>
    %cst_20 = arith.constant dense<0.000000e+00> : vector<128xf32>
    %39 = vector.multi_reduction <add>, %38, %cst_20 [0] : vector<8x128xf32> to vector<128xf32>
    %40 = vector.shape_cast %39 : vector<128xf32> to vector<1x128xf32>
    %cst_21 = arith.constant 1.250000e-01 : f32
    %41 = vector.broadcast %cst_21 : f32 to vector<1x128xf32>
    %42 = arith.mulf %40, %41 : vector<1x128xf32>
    %43 = arith.mulf %37, %37 : vector<1x128xf32>
    %44 = arith.subf %42, %43 : vector<1x128xf32>
    %cst_22 = arith.constant 0.000000e+00 : f32
    %45 = vector.broadcast %cst_22 : f32 to vector<1x128xf32>
    %46 = arith.maximumf %44, %45 : vector<1x128xf32>
    %c2 = arith.constant 2 : index
    %c0_23 = arith.constant 0 : index
    %47 = vector.load %arg2[%c2, %c0_23] : memref<5x128xf32, #tpu.memory_space<vmem>>, vector<1x128xf32>
    %c3 = arith.constant 3 : index
    %c0_24 = arith.constant 0 : index
    %48 = vector.load %arg2[%c3, %c0_24] : memref<5x128xf32, #tpu.memory_space<vmem>>, vector<1x128xf32>
    %cst_25 = arith.constant 9.99999974E-6 : f32
    %49 = vector.broadcast %cst_25 : f32 to vector<1x128xf32>
    %50 = arith.addf %46, %49 : vector<1x128xf32>
    %51 = math.rsqrt %50 : vector<1x128xf32>
    %52 = arith.mulf %47, %51 : vector<1x128xf32>
    %53 = arith.mulf %37, %52 : vector<1x128xf32>
    %54 = arith.subf %48, %53 : vector<1x128xf32>
    %55 = vector.broadcast %52 : vector<1x128xf32> to vector<8x128xf32>
    %56 = arith.mulf %33, %55 : vector<8x128xf32>
    %57 = vector.broadcast %54 : vector<1x128xf32> to vector<8x128xf32>
    %58 = arith.addf %56, %57 : vector<8x128xf32>
    %cst_26 = arith.constant 0.000000e+00 : f32
    %59 = vector.broadcast %cst_26 : f32 to vector<8x128xf32>
    %60 = arith.maximumf %58, %59 : vector<8x128xf32>
    %c2_27 = arith.constant 2 : index
    %c0_28 = arith.constant 0 : index
    %c0_29 = arith.constant 0 : index
    %61 = vector.load %arg1[%c2_27, %c0_28, %c0_29] : memref<3x128x128xf32, #tpu.memory_space<vmem>>, vector<1x128x128xf32>
    %62 = vector.shape_cast %61 : vector<1x128x128xf32> to vector<128x128xf32>
    %cst_30 = arith.constant dense<0.000000e+00> : vector<8x128xf32>
    %63 = tpu.matmul %60, %62, %cst_30 {dimension_numbers = #tpu.dot_dimension_numbers<[1], [0], [0], [1], [0, 0, 1, 1], [], []>} : vector<8x128xf32>, vector<128x128xf32>, vector<8x128xf32> -> vector<8x128xf32>
    %c4 = arith.constant 4 : index
    %c0_31 = arith.constant 0 : index
    %64 = vector.load %arg2[%c4, %c0_31] : memref<5x128xf32, #tpu.memory_space<vmem>>, vector<1x128xf32>
    %65 = vector.broadcast %64 : vector<1x128xf32> to vector<8x128xf32>
    %66 = arith.addf %63, %65 : vector<8x128xf32>
    %c0_32 = arith.constant 0 : index
    %c0_33 = arith.constant 0 : index
    %67 = vector.load %arg3[%c0_32, %c0_33] : memref<8x128xf32, #tpu.memory_space<vmem>>, vector<8x128xf32>
    tpu.vector_store %arg3[%c0_32, %c0_33], %66 {strides = array<i32>} : memref<8x128xf32, #tpu.memory_space<vmem>>, vector<8x128xf32>,
    return
  }
}

</mosaic_0001>

<bundles_post_ra>
// kernel: tpu_custom_call.1
= control target key start
LH: loop header
LB: loop body
LE: loop exit
PB: predicated region body
PF: predicated region fallthrough
CT: control target
= control target key end

     0   :  { %8 = vsyncpa [#allocation3], 0  ;;  %s762_s0 = inlined_call_operand.hbm [shape: f32[8,128], index: 0, kind: input, shape index: {}]   ;;  %s763_s1 = inlined_call_operand.hbm [shape: f32[3,128,128], index: 1, kind: input, shape index: {}]   ;;  %s764_s2 = inlined_call_operand.hbm [shape: f32[5,128], index: 2, kind: input, shape index: {}]   ;;  %s765_s3 = inlined_call_operand.hbm [shape: f32[8,128], index: 3, kind: output, shape index: {}]  }
   0x1   :  { %9 = vsyncpa [#allocation6], 0 }
   0x2   :  { %10 = vsyncpa [#allocation4], 0  ;;  %s662_s12 = smov [#allocation5]  }
   0x3   :  { %s26_s13 = sshll.u32 %s662_s12, 4  ;;  %s27_s13 = int_to_ptr.vmem [resolvable:$true] %s26_s13 }
   0x4   :  { %s584_s14 = scalar_lea.vmem %s27_s13, 6144  ;;  %p589_p1 = scmp.lt.s32.totalorder %s27_s13, %s27_s13 }
   0x5   :  { %p585_p0 = scmp.ne.s32.totalorder %s27_s13, %s584_s14  ;;  %p590_p2 = scmp.lt.s32.totalorder %s584_s14, %s584_s14 }
   0x7   :  { %p591_p3 = por %p590_p2, %p589_p1 }
   0x9   :  { %p592_p4 = pnand %p591_p3, %p585_p0 }
   0xb   :  { %595 = shalt.err (!%p592_p4)
}
   0xc   :  { %s663_s15 = smov 128   ;;  %s664_s16 = smov 8  }
   0xd   :  { %32 = dma.hbm_to_vmem [thread:$0]  %s763_s1, 6144, %s27_s13, [#allocation6], %s663_s15, %s663_s15, %s664_s16  }
   0xe   :  { %s665_s19 = smov [#allocation2]   ;;  %s666_s21 = smov [#allocation7]  }
   0xf   :  { %s17_s20 = sshll.u32 %s665_s19, 4  ;;  %s39_s22 = sshll.u32 %s666_s21, 4  ;;  %s18_s20 = int_to_ptr.vmem [resolvable:$true] %s17_s20  ;;  %s40_s22 = int_to_ptr.vmem [resolvable:$true] %s39_s22 }
  0x10   :  { %s604_s23 = scalar_lea.vmem %s18_s20, 128  ;;  %p609_p6 = scmp.lt.s32.totalorder %s18_s20, %s18_s20 }
  0x11   :  { %p605_p5 = scmp.ne.s32.totalorder %s18_s20, %s604_s23  ;;  %p610_p7 = scmp.lt.s32.totalorder %s604_s23, %s604_s23 }
  0x13   :  { %p611_p8 = por %p610_p7, %p609_p6 }
  0x15   :  { %p612_p9 = pnand %p611_p8, %p605_p5 }
  0x17   :  { %615 = shalt.err (!%p612_p9)
}
  0x18   :  { %20 = dma.hbm_to_vmem [thread:$0]  %s762_s0, 128, %s18_s20, [#allocation3]  }
  0x19   :  { %s624_s26 = scalar_lea.vmem %s40_s22, 128  ;;  %p629_p11 = scmp.lt.s32.totalorder %s40_s22, %s40_s22 }
  0x1a   :  { %p625_p10 = scmp.ne.s32.totalorder %s40_s22, %s624_s26  ;;  %p630_p12 = scmp.lt.s32.totalorder %s624_s26, %s624_s26 }
  0x1c   :  { %p631_p13 = por %p630_p12, %p629_p11 }
  0x1e   :  { %p632_p0 = pnand %p631_p13, %p625_p10 }
  0x20   :  { %635 = shalt.err (!%p632_p0)
}
  0x21   :  { %42 = dma.hbm_to_vmem [thread:$0]  %s764_s2, 128, %s40_s22, [#allocation6]  }
  0x22   :  { %656 = dma.done.wait [#allocation3], 128  }
  0x23   :  { %657 = vsyncadd [#allocation3], 4294967168 }
  0x24   :  { %658 = dma.done.wait [#allocation6], 6272  }
  0x25   :  { %659 = vsyncadd [#allocation6], 4294961024  ;;  %v667_v0 = vmov 0.0   ;;  %vm668_vm0 = vmmov 0   ;;  %v68_v1 = vld [vmem:[#allocation5 + $0x78] sm:$0xff]  ;;  %v67_v2 = vld [vmem:[#allocation5 + $0x70] sm:$0xff]  ;;  %v164_v55 = vlaneseq }
  0x26   :  { %459 = vmatprep.subr.mxu0 %v667_v0  ;;  %491 = vmatprep.mubr.msk.f32.mxu0 %vm668_vm0, %v667_v0  ;;  %v66_v3 = vld [vmem:[#allocation5 + $0x68] sm:$0xff]  ;;  %v65_v4 = vld [vmem:[#allocation5 + $0x60] sm:$0xff]  ;;  %v64_v5 = vld [vmem:[#allocation5 + $0x58] sm:$0xff]  ;;  %s669_s0 = smov [#allocation8]  }
  0x27   :  { %494 = vmatprep.subr.mxu1 %v667_v0  ;;  %526 = vmatprep.mubr.msk.f32.mxu1 %vm668_vm0, %v667_v0  ;;  %v63_v6 = vld [vmem:[#allocation5 + $0x50] sm:$0xff]  ;;  %v62_v7 = vld [vmem:[#allocation5 + $0x48] sm:$0xff]  ;;  %v61_v8 = vld [vmem:[#allocation5 + $0x40] sm:$0xff]  ;;  %v165_v56 = vshrl.u32 %v164_v55, 7  ;;  %s397_s2 = sshll.u32 %s669_s0, 4  ;;  %s398_s2 = int_to_ptr.vmem [resolvable:$true] %s397_s2 }
  0x28   :  { %460 = vmatpush3.msra.mxu0 %v68_v1  ;;  %v60_v9 = vld [vmem:[#allocation5 + $0x38] sm:$0xff]  ;;  %v59_v10 = vld [vmem:[#allocation5 + $0x30] sm:$0xff]  ;;  %v58_v11 = vld [vmem:[#allocation5 + $0x28] sm:$0xff]  ;;  %s636_s28 = scalar_lea.vmem %s398_s2, 128  ;;  %p641_p2 = scmp.lt.s32.totalorder %s398_s2, %s398_s2 }
  0x29   :  { %461 = vmatprep.subr.mxu0 %v667_v0  ;;  %v57_v12 = vld [vmem:[#allocation5 + $0x20] sm:$0xff]  ;;  %v56_v13 = vld [vmem:[#allocation5 + $0x18] sm:$0xff]  ;;  %v55_v14 = vld [vmem:[#allocation5 + $0x10] sm:$0xff]  ;;  %v738_v58 = vsub.s32 0, %v165_v56  ;;  %p637_p1 = scmp.ne.s32.totalorder %s398_s2, %s636_s28  ;;  %p642_p3 = scmp.lt.s32.totalorder %s636_s28, %s636_s28 }
  0x2a   :  { %462 = vmatpush3.msra.mxu0 %v67_v2  ;;  %v54_v15 = vld [vmem:[#allocation5 + $0x8] sm:$0xff]  ;;  %v53_v16 = vld [vmem:[#allocation5] sm:$0xff]  ;;  %v52_v17 = vld [vmem:[#allocation2] sm:$0xff] }
  0x2b   :  { %463 = vmatprep.subr.mxu0 %v667_v0  ;;  %v191_v18 = vld [vmem:[#allocation5 + $0xf8] sm:$0xff]  ;;  %v190_v19 = vld [vmem:[#allocation5 + $0xf0] sm:$0xff]  ;;  %v189_v20 = vld [vmem:[#allocation5 + $0xe8] sm:$0xff]  ;;  %p643_p4 = por %p642_p3, %p641_p2 }
  0x2c   :  { %464 = vmatpush3.msra.mxu0 %v66_v3  ;;  %495 = vmatpush3.msra.mxu1 %v191_v18  ;;  %v188_v21 = vld [vmem:[#allocation5 + $0xe0] sm:$0xff]  ;;  %v187_v22 = vld [vmem:[#allocation5 + $0xd8] sm:$0xff]  ;;  %v186_v23 = vld [vmem:[#allocation5 + $0xd0] sm:$0xff] }
  0x2d   :  { %465 = vmatprep.subr.mxu0 %v667_v0  ;;  %496 = vmatprep.subr.mxu1 %v667_v0  ;;  %v185_v24 = vld [vmem:[#allocation5 + $0xc8] sm:$0xff]  ;;  %v184_v25 = vld [vmem:[#allocation5 + $0xc0] sm:$0xff]  ;;  %v183_v26 = vld [vmem:[#allocation5 + $0xb8] sm:$0xff]  ;;  %p644_p5 = pnand %p643_p4, %p637_p1 }
  0x2e   :  { %466 = vmatpush3.msra.mxu0 %v65_v4  ;;  %497 = vmatpush3.msra.mxu1 %v190_v19  ;;  %v182_v27 = vld [vmem:[#allocation5 + $0xb0] sm:$0xff]  ;;  %v181_v28 = vld [vmem:[#allocation5 + $0xa8] sm:$0xff]  ;;  %v180_v29 = vld [vmem:[#allocation5 + $0xa0] sm:$0xff] }
  0x2f   :  { %467 = vmatprep.subr.mxu0 %v667_v0  ;;  %498 = vmatprep.subr.mxu1 %v667_v0  ;;  %v179_v30 = vld [vmem:[#allocation5 + $0x98] sm:$0xff]  ;;  %v178_v31 = vld [vmem:[#allocation5 + $0x90] sm:$0xff]  ;;  %v177_v32 = vld [vmem:[#allocation5 + $0x88] sm:$0xff] }
  0x30   :  { %468 = vmatpush3.msra.mxu0 %v64_v5  ;;  %499 = vmatpush3.msra.mxu1 %v189_v20  ;;  %v176_v33 = vld [vmem:[#allocation5 + $0x80] sm:$0xff]  ;;  %v302_v18 = vld [vmem:[#allocation5 + $0x118] sm:$0xff]  ;;  %v301_v19 = vld [vmem:[#allocation5 + $0x110] sm:$0xff] }
  0x31   :  { %469 = vmatprep.subr.mxu0 %v667_v0  ;;  %500 = vmatprep.subr.mxu1 %v667_v0  ;;  %v157_v57 = vld [vmem:[#allocation7] sm:$0x1]  ;;  %v158_v61 = vld [vmem:[#allocation7 + $0x1] sm:$0x1]  ;;  %v300_v20 = vld [vmem:[#allocation5 + $0x108] sm:$0xff] }
  0x32   :  { %470 = vmatpush3.msra.mxu0 %v63_v6  ;;  %501 = vmatpush3.msra.mxu1 %v188_v21  ;;  %v314_v6 = vld [vmem:[#allocation5 + $0x178] sm:$0xff]  ;;  %v299_v21 = vld [vmem:[#allocation5 + $0x100] sm:$0xff] }
  0x33   :  { %471 = vmatprep.subr.mxu0 %v667_v0  ;;  %502 = vmatprep.subr.mxu1 %v667_v0 }
  0x34   :  { %472 = vmatpush3.msra.mxu0 %v62_v7  ;;  %503 = vmatpush3.msra.mxu1 %v187_v22  ;;  %v313_v7 = vld [vmem:[#allocation5 + $0x170] sm:$0xff] }
  0x35   :  { %473 = vmatprep.subr.mxu0 %v667_v0  ;;  %504 = vmatprep.subr.mxu1 %v667_v0 }
  0x36   :  { %474 = vmatpush3.msra.mxu0 %v61_v8  ;;  %505 = vmatpush3.msra.mxu1 %v186_v23  ;;  %v312_v8 = vld [vmem:[#allocation5 + $0x168] sm:$0xff] }
  0x37   :  { %475 = vmatprep.subr.mxu0 %v667_v0  ;;  %506 = vmatprep.subr.mxu1 %v667_v0 }
  0x38   :  { %476 = vmatpush3.msra.mxu0 %v60_v9  ;;  %507 = vmatpush3.msra.mxu1 %v185_v24  ;;  %v311_v9 = vld [vmem:[#allocation5 + $0x160] sm:$0xff] }
  0x39   :  { %477 = vmatprep.subr.mxu0 %v667_v0  ;;  %508 = vmatprep.subr.mxu1 %v667_v0 }
  0x3a   :  { %478 = vmatpush3.msra.mxu0 %v59_v10  ;;  %509 = vmatpush3.msra.mxu1 %v184_v25  ;;  %v310_v10 = vld [vmem:[#allocation5 + $0x158] sm:$0xff] }
  0x3b   :  { %479 = vmatprep.subr.mxu0 %v667_v0  ;;  %510 = vmatprep.subr.mxu1 %v667_v0 }
  0x3c   :  { %480 = vmatpush3.msra.mxu0 %v58_v11  ;;  %511 = vmatpush3.msra.mxu1 %v183_v26  ;;  %v309_v11 = vld [vmem:[#allocation5 + $0x150] sm:$0xff] }
  0x3d   :  { %481 = vmatprep.subr.mxu0 %v667_v0  ;;  %512 = vmatprep.subr.mxu1 %v667_v0 }
  0x3e   :  { %482 = vmatpush3.msra.mxu0 %v57_v12  ;;  %513 = vmatpush3.msra.mxu1 %v182_v27  ;;  %v308_v12 = vld [vmem:[#allocation5 + $0x148] sm:$0xff] }
  0x3f   :  { %483 = vmatprep.subr.mxu0 %v667_v0  ;;  %514 = vmatprep.subr.mxu1 %v667_v0 }
  0x40   :  { %484 = vmatpush3.msra.mxu0 %v56_v13  ;;  %515 = vmatpush3.msra.mxu1 %v181_v28  ;;  %v307_v13 = vld [vmem:[#allocation5 + $0x140] sm:$0xff] }
  0x41   :  { %485 = vmatprep.subr.mxu0 %v667_v0  ;;  %516 = vmatprep.subr.mxu1 %v667_v0 }
  0x42   :  { %486 = vmatpush3.msra.mxu0 %v55_v14  ;;  %517 = vmatpush3.msra.mxu1 %v180_v29  ;;  %v306_v14 = vld [vmem:[#allocation5 + $0x138] sm:$0xff] }
  0x43   :  { %487 = vmatprep.subr.mxu0 %v667_v0  ;;  %518 = vmatprep.subr.mxu1 %v667_v0 }
  0x44   :  { %488 = vmatpush3.msra.mxu0 %v54_v15  ;;  %519 = vmatpush3.msra.mxu1 %v179_v30  ;;  %v305_v15 = vld [vmem:[#allocation5 + $0x130] sm:$0xff] }
  0x45   :  { %489 = vmatprep.subr.mxu0 %v667_v0  ;;  %520 = vmatprep.subr.mxu1 %v667_v0 }
  0x46   :  { %490 = vmatpush3.msra.mxu0 %v53_v16  ;;  %521 = vmatpush3.msra.mxu1 %v178_v31  ;;  %v304_v16 = vld [vmem:[#allocation5 + $0x128] sm:$0xff] }
  0x47   :  { %492 = vmatmul.mubr.f32.vlgmr.msra.gmra.mxu0 %v52_v17  ;;  %529 = vmatprep.subr.mxu0 %v667_v0  ;;  %v303_v17 = vld [vmem:[#allocation5 + $0x120] sm:$0xff] }
  0x48   :  { %561 = vmatprep.mubr.msk.f32.mxu0 %vm668_vm0, %v667_v0  ;;  %522 = vmatprep.subr.mxu1 %v667_v0 }
  0x49   :  { %523 = vmatpush3.msra.mxu1 %v177_v32  ;;  %530 = vmatpush3.msra.mxu0 %v314_v6 }
  0x4a   :  { %524 = vmatprep.subr.mxu1 %v667_v0  ;;  %531 = vmatprep.subr.mxu0 %v667_v0 }
  0x4b   :  { %525 = vmatpush3.msra.mxu1 %v176_v33  ;;  %532 = vmatpush3.msra.mxu0 %v313_v7 }
  0x4c   :  { %533 = vmatprep.subr.mxu0 %v667_v0 }
  0x4d   :  { %534 = vmatpush3.msra.mxu0 %v312_v8 }
  0x4e   :  { %535 = vmatprep.subr.mxu0 %v667_v0 }
  0x4f   :  { %536 = vmatpush3.msra.mxu0 %v311_v9 }
  0x50   :  { %537 = vmatprep.subr.mxu0 %v667_v0 }
  0x51   :  { %538 = vmatpush3.msra.mxu0 %v310_v10 }
  0x52   :  { %539 = vmatprep.subr.mxu0 %v667_v0 }
  0x53   :  { %540 = vmatpush3.msra.mxu0 %v309_v11 }
  0x54   :  { %541 = vmatprep.subr.mxu0 %v667_v0 }
  0x55   :  { %542 = vmatpush3.msra.mxu0 %v308_v12 }
  0x56   :  { %543 = vmatprep.subr.mxu0 %v667_v0 }
  0x57   :  { %544 = vmatpush3.msra.mxu0 %v307_v13 }
  0x58   :  { %545 = vmatprep.subr.mxu0 %v667_v0 }
  0x59   :  { %546 = vmatpush3.msra.mxu0 %v306_v14 }
  0x5a   :  { %547 = vmatprep.subr.mxu0 %v667_v0 }
  0x5b   :  { %548 = vmatpush3.msra.mxu0 %v305_v15 }
  0x5c   :  { %549 = vmatprep.subr.mxu0 %v667_v0 }
  0x5d   :  { %550 = vmatpush3.msra.mxu0 %v304_v16 }
  0x5e   :  { %551 = vmatprep.subr.mxu0 %v667_v0 }
  0x5f   :  { %552 = vmatpush3.msra.mxu0 %v303_v17 }
  0x60   :  { %553 = vmatprep.subr.mxu0 %v667_v0 }
  0x61   :  { %554 = vmatpush3.msra.mxu0 %v302_v18 }
  0x62   :  { %555 = vmatprep.subr.mxu0 %v667_v0 }
  0x63   :  { %556 = vmatpush3.msra.mxu0 %v301_v19 }
  0x64   :  { %557 = vmatprep.subr.mxu0 %v667_v0 }
  0x65   :  { %558 = vmatpush3.msra.mxu0 %v300_v20 }
  0x66   :  { %559 = vmatprep.subr.mxu0 %v667_v0 }
  0x67   :  { %560 = vmatpush3.msra.mxu0 %v299_v21 }
 0x107   :  { %v135_v34 = vpop.f32.mrf.mxu0 }
 0x108   :  { %v139_v35 = vrot.slane %v135_v34, 4  ;;  %v146_v36 = vmul.f32 %v135_v34, %v135_v34 }
 0x109   :  { %v493_v37 = vpop.f32.mrf.mxu0 }
 0x10a   :  { %v140_v38 = vadd.f32 %v139_v35, %v135_v34  ;;  %v147_v39 = vrot.slane %v146_v36, 4 }
 0x10c   :  { %v141_v40 = vrot.slane %v140_v38, 2  ;;  %v148_v41 = vadd.f32 %v147_v39, %v146_v36 }
 0x10e   :  { %v142_v42 = vadd.f32 %v141_v40, %v140_v38  ;;  %v149_v43 = vrot.slane %v148_v41, 2 }
 0x110   :  { %v143_v44 = vrot.slane %v142_v42, 1  ;;  %v150_v45 = vadd.f32 %v149_v43, %v148_v41 }
 0x112   :  { %v144_v46 = vadd.f32 %v143_v44, %v142_v42  ;;  %v151_v47 = vrot.slane %v150_v45, 1  ;;  %v280_v42 = vld [vmem:[#allocation7 + $0x2] sm:$0x1] }
 0x114   :  { %v145_v48 = vmul.f32 0.125, %v144_v46  ;;  %v152_v49 = vadd.f32 %v151_v47, %v150_v45  ;;  %v281_v45 = vld [vmem:[#allocation7 + $0x3] sm:$0x1] }
 0x116   :  { %v153_v50 = vmul.f32 0.125, %v152_v49  ;;  %v154_v51 = vmul.f32 %v145_v48, %v145_v48 }
 0x118   :  { %v155_v52 = vsub.f32 %v153_v50, %v154_v51 }
 0x11a   :  { %v156_v53 = vmax.f32 %v155_v52, 0.0 }
 0x11c   :  { %v159_v54 = vadd.f32 1e-05, %v156_v53  ;;  %v407_v53 = vld [vmem:[#allocation7 + $0x4] ss:$0 sm:$0xff] }
 0x11e   :  { %572 = vrsqrt.f32 %v159_v54 }
 0x12b   :  { %v573_v59 = vpop.eup %572 }
 0x12c   :  { %v161_v60 = vmul.f32 %v573_v59, %v157_v57 }
 0x12e   :  { %v167_v62 = vrot.slane %v161_v60, %v738_v58  ;;  %v162_v63 = vmul.f32 %v161_v60, %v145_v48 }
 0x130   :  { %v163_v1 = vsub.f32 %v158_v61, %v162_v63  ;;  %v168_v2 = vmul.f32 %v167_v62, %v135_v34 }
 0x132   :  { %v172_v3 = vrot.slane %v163_v1, %v738_v58 }
 0x134   :  { %v173_v4 = vadd.f32 %v172_v3, %v168_v2 }
 0x136   :  { %v174_v5 = vmax.f32 %v173_v4, 0.0 }
 0x138   :  { %527 = vmatmul.mubr.f32.vlgmr.msra.gmra.mxu1 %v174_v5 }
 0x1f8   :  { %v258_v22 = vpop.f32.mrf.mxu1 }
 0x1f9   :  { %v262_v23 = vrot.slane %v258_v22, 4  ;;  %v269_v24 = vmul.f32 %v258_v22, %v258_v22 }
 0x1fa   :  { %v528_v25 = vpop.f32.mrf.mxu1 }
 0x1fb   :  { %v263_v26 = vadd.f32 %v262_v23, %v258_v22  ;;  %v270_v27 = vrot.slane %v269_v24, 4 }
 0x1fd   :  { %v264_v28 = vrot.slane %v263_v26, 2  ;;  %v271_v29 = vadd.f32 %v270_v27, %v269_v24 }
 0x1ff   :  { %v265_v30 = vadd.f32 %v264_v28, %v263_v26  ;;  %v272_v31 = vrot.slane %v271_v29, 2 }
 0x201   :  { %v266_v32 = vrot.slane %v265_v30, 1  ;;  %v273_v33 = vadd.f32 %v272_v31, %v271_v29 }
 0x203   :  { %v267_v34 = vadd.f32 %v266_v32, %v265_v30  ;;  %v274_v35 = vrot.slane %v273_v33, 1 }
 0x205   :  { %v268_v36 = vmul.f32 0.125, %v267_v34  ;;  %v275_v37 = vadd.f32 %v274_v35, %v273_v33 }
 0x207   :  { %v276_v38 = vmul.f32 0.125, %v275_v37  ;;  %v277_v39 = vmul.f32 %v268_v36, %v268_v36 }
 0x209   :  { %v278_v0 = vsub.f32 %v276_v38, %v277_v39 }
 0x20b   :  { %v279_v40 = vmax.f32 %v278_v0, 0.0 }
 0x20d   :  { %v282_v41 = vadd.f32 1e-05, %v279_v40 }
 0x20f   :  { %574 = vrsqrt.f32 %v282_v41 }
 0x21c   :  { %v575_v43 = vpop.eup %574 }
 0x21d   :  { %v284_v44 = vmul.f32 %v575_v43, %v280_v42 }
 0x21f   :  { %v285_v46 = vmul.f32 %v284_v44, %v268_v36  ;;  %v290_v47 = vrot.slane %v284_v44, %v738_v58 }
 0x221   :  { %v286_v48 = vsub.f32 %v281_v45, %v285_v46  ;;  %v291_v49 = vmul.f32 %v290_v47, %v258_v22 }
 0x223   :  { %v295_v50 = vrot.slane %v286_v48, %v738_v58 }
 0x225   :  { %v296_v51 = vadd.f32 %v295_v50, %v291_v49 }
 0x227   :  { %v297_v52 = vmax.f32 %v296_v51, 0.0 }
 0x229   :  { %562 = vmatmul.mubr.f32.vlgmr.msra.gmra.mxu0 %v297_v52 }
 0x2e9   :  { %v386_v54 = vpop.f32.mrf.mxu0 }
 0x2ea   :  { %v387_v55 = vadd.f32 %v407_v53, %v386_v54 }
 0x2eb   :  { %v563_v56 = vpop.f32.mrf.mxu0 }
 0x2ec   :  { %390 = vst [vmem:[#allocation8] sm:$0xff] %v387_v55 }
 0x2ed   :  { %647 = shalt.err (!%p644_p5)
}
 0x2ee   :  { %400 = dma.vmem_to_hbm [thread:$0]  %s398_s2, 128, %s765_s3, [#allocation4]  }
 0x2ef   :  { %660 = dma.done.wait [#allocation4], 128  }
 0x2f0   :  { %661 = vsyncadd [#allocation4], 4294967168 }
 0x2f1   :  { %404 = vsyncpa [#allocation3], 1 }
 0x2f2   :  { %405 = vsyncpa [#allocation6], 1 }
 0x2f3   :  { %406 = vsyncpa [#allocation4], 1 }

</bundles_post_ra>
